<compile_context>
chip_gen: v5e
topology: v5e:2x2
jax: 0.10.0
libtpu: 0.0.40
codegen_flags: <defaults>
</compile_context>

<pallas_src>
import functools

import jax
import jax.numpy as jnp
from jax import lax
from jax.experimental import pallas as pl
from jax.experimental.pallas import tpu as pltpu

WIN = 16     # frame (window) size of the synthetic pipeline
HOP = 8      # hop size (WIN == 2 * HOP -> 50% overlap, handled with two dots)
FEAT = 128   # output feature dim; 128 keeps output stores lane-dense

MAX_FRAME_TILE = 2048   # 1 MiB f32 out tile; ~6.5 MiB total VMEM double-buffered


def _round_up(n, m):
    return ((n + m - 1) // m) * m


def _ceil_div(a, b):
    return -(-a // b)


def _num_frames(lengths):
    return jnp.where(lengths >= WIN, (lengths - WIN) // HOP + 1, 0).astype(jnp.int32)


def _feature_kernel(len_ref, xlo_ref, xhi_ref, wlo_ref, whi_ref, bias_ref,
                    out_ref, *, frame_tile):
    """One grid step == one (batch element, frame tile).

    len_ref  : SMEM (B,) int32                 -- valid frame count per sequence
    xlo_ref  : VMEM (1, frame_tile, HOP) f32   -- hop block f   for each frame f
    xhi_ref  : VMEM (1, frame_tile, HOP) f32   -- hop block f+1 for each frame f
    wlo_ref  : VMEM (HOP, FEAT) bf16           -- W[:HOP]
    whi_ref  : VMEM (HOP, FEAT) bf16           -- W[HOP:]
    bias_ref : VMEM (1, FEAT) f32
    out_ref  : VMEM (1, frame_tile, FEAT)      -- padded features (zeros past length)
    """
    b = pl.program_id(0)
    j = pl.program_id(1)
    n = len_ref[b]                 # valid frame count of this sequence
    f0 = j * frame_tile            # first frame of this tile

    @pl.when(f0 < n)
    def _compute():
        # Frame f = [hop block f ++ hop block f+1]; the two halves arrive as
        # separate, already-shifted DMA blocks, so no in-kernel shift/relayout.
        lo = xlo_ref[0].astype(jnp.bfloat16)          # (frame_tile, HOP)
        hi = xhi_ref[0].astype(jnp.bfloat16)          # (frame_tile, HOP)
        y = jnp.dot(lo, wlo_ref[...], preferred_element_type=jnp.float32)
        y = y + jnp.dot(hi, whi_ref[...], preferred_element_type=jnp.float32)
        y = jnp.maximum(y + bias_ref[...], 0.0)       # bias + ReLU, f32

        # Reproduce pad_sequence(padding_value=0.0): zero frames >= valid count.
        row = f0 + lax.broadcasted_iota(jnp.int32, (frame_tile, 1), 0)
        out_ref[0] = jnp.where(row < n, y, 0.0).astype(out_ref.dtype)

    @pl.when(f0 >= n)
    def _pad_only():
        # Tile entirely past this sequence's valid frames: skip all compute,
        # still write zeros so the writeback reproduces pad_sequence padding.
        out_ref[...] = jnp.zeros(out_ref.shape, out_ref.dtype)


@functools.partial(jax.jit, static_argnames=("out_dtype",))
def feature_extractor(x, input_lengths, weight, bias, *, out_dtype=jnp.float32):
    """Equivalent of _ModuleFeatureExtractor.forward.

    x:             (B, T) float32 waveform
    input_lengths: (B,)   int32
    weight:        (WIN, FEAT) float32
    bias:          (1, FEAT)   float32
    out_dtype:     feature dtype; jnp.bfloat16 halves the dominant HBM write
                   traffic if downstream allows (default float32 = module dtype)
    returns (features (B, n_frames, FEAT), lengths (B,) int32)
    """
    B, T = x.shape
    if T < WIN:
        raise ValueError("T must be >= WIN")
    input_lengths = jnp.minimum(input_lengths.astype(jnp.int32), T)
    lengths = _num_frames(input_lengths)

    # Static (shape-derived) frame count: no host sync, no per-length recompile.
    n_frames = (T - WIN) // HOP + 1

    # Frame tile: as large as MAX_FRAME_TILE, chosen to minimize padding.
    n_tiles = _ceil_div(n_frames, MAX_FRAME_TILE)
    frame_tile = _round_up(_ceil_div(n_frames, n_tiles), 8)
    n_tiles = _ceil_div(n_frames, frame_tile)
    nf_pad = n_tiles * frame_tile

    # Two duplication-free hop-blocked views of the (zero padded) waveform:
    # x_lo[b, f] = samples [f*HOP, (f+1)*HOP)      == first half of frame f
    # x_hi[b, f] = samples [(f+1)*HOP, (f+2)*HOP)  == second half of frame f
    t_pad = max(T, (nf_pad + 1) * HOP)
    x_pad = jnp.pad(x, ((0, 0), (0, t_pad - T)))
    x_lo = x_pad[:, :nf_pad * HOP].reshape(B, nf_pad, HOP)
    x_hi = x_pad[:, HOP:(nf_pad + 1) * HOP].reshape(B, nf_pad, HOP)

    w = weight.astype(jnp.bfloat16)
    w_lo, w_hi = w[:HOP], w[HOP:]
    bias2 = jnp.reshape(bias, (1, FEAT)).astype(jnp.float32)

    kernel = functools.partial(_feature_kernel, frame_tile=frame_tile)

    # Output allocated at exactly (B, n_frames, FEAT): the last (possibly
    # partial) frame tile is masked on writeback, so there is no host-side
    # trim copy of the full feature tensor.
    feats = pl.pallas_call(
        kernel,
        out_shape=jax.ShapeDtypeStruct((B, n_frames, FEAT), out_dtype),
        grid_spec=pltpu.PrefetchScalarGridSpec(
            num_scalar_prefetch=1,                 # `lengths` -> SMEM
            grid=(B, n_tiles),                     # frames axis innermost/fastest
            in_specs=[
                pl.BlockSpec((1, frame_tile, HOP), lambda b, j, lens: (b, j, 0)),
                pl.BlockSpec((1, frame_tile, HOP), lambda b, j, lens: (b, j, 0)),
                pl.BlockSpec((HOP, FEAT), lambda b, j, lens: (0, 0)),
                pl.BlockSpec((HOP, FEAT), lambda b, j, lens: (0, 0)),
                pl.BlockSpec((1, FEAT), lambda b, j, lens: (0, 0)),
            ],
            out_specs=pl.BlockSpec((1, frame_tile, FEAT),
                                   lambda b, j, lens: (b, j, 0)),
        ),
        compiler_params=pltpu.CompilerParams(
            # Both axes independent; on v7x the B*n_tiles steps are split
            # across the two TensorCores (B >= 2 keeps both cores busy even
            # when n_tiles collapses to 1).
            dimension_semantics=("parallel", "parallel"),
            vmem_limit_bytes=32 * 1024 * 1024),
    )(lengths, x_lo, x_hi, w_lo, w_hi, bias2)

    return feats, lengths


if __name__ == "__main__":
    key = jax.random.PRNGKey(0)
    k_x, k_w, k_b = jax.random.split(key, 3)

    B, T = 2, 128
    x = jax.random.normal(k_x, (B, T), dtype=jnp.float32)
    input_lengths = jnp.array([128, 80], dtype=jnp.int32)

    # Deterministic synthetic pipeline parameters.
    weight = jax.random.normal(k_w, (WIN, FEAT), dtype=jnp.float32) * 0.1
    bias = jax.random.normal(k_b, (1, FEAT), dtype=jnp.float32) * 0.01

    features, lengths = feature_extractor(x, input_lengths, weight, bias)
    jax.block_until_ready((features, lengths))

    # Pure-JAX reference, with the same bf16 rounding of x/W as the kernel.
    n_frames = (T - WIN) // HOP + 1
    xb = x.astype(jnp.bfloat16).astype(jnp.float32)
    wb = weight.astype(jnp.bfloat16).astype(jnp.float32)
    idx = jnp.arange(n_frames)[:, None] * HOP + jnp.arange(WIN)[None, :]
    ref = jnp.maximum(xb[:, idx] @ wb + bias, 0.0)
    row = jnp.arange(n_frames)[None, :, None]
    ref = jnp.where(row < lengths[:, None, None], ref, 0.0)

    assert features.shape == (B, n_frames, FEAT)
    assert features.dtype == jnp.float32
    assert lengths.tolist() == [(128 - WIN) // HOP + 1, (80 - WIN) // HOP + 1]
    assert jnp.allclose(features, ref, atol=1e-4, rtol=1e-4)

    print("KERNEL_OK")
</pallas_src>

<mosaic_0001>
module attributes {stable_mosaic.version = 11 : i64} {
  func.func @_feature_kernel(%arg0: i32, %arg1: i32, %arg2: memref<2xi32, #tpu.memory_space<smem>>, %arg3: memref<1x16x8xf32, #tpu.memory_space<vmem>>, %arg4: memref<1x16x8xf32, #tpu.memory_space<vmem>>, %arg5: memref<8x128xbf16, #tpu.memory_space<vmem>>, %arg6: memref<8x128xbf16, #tpu.memory_space<vmem>>, %arg7: memref<1x128xf32, #tpu.memory_space<vmem>>, %arg8: memref<1x16x128xf32, #tpu.memory_space<vmem>>) attributes {dimension_semantics = [#tpu.dimension_semantics<parallel>, #tpu.dimension_semantics<parallel>], iteration_bounds = array<i64: 2, 1>, scalar_prefetch = 1 : i64, scratch_operands = 0 : i64, tpu.core_type = #tpu.core_type<tc>, window_params = [{transform_indices = @transform_0, window_bounds = array<i64: 1, 16, 8>}, {transform_indices = @transform_1, window_bounds = array<i64: 1, 16, 8>}, {pipeline_mode = #tpu.pipeline_mode<synchronous>, transform_indices = @transform_2, window_bounds = array<i64: 8, 128>}, {pipeline_mode = #tpu.pipeline_mode<synchronous>, transform_indices = @transform_3, window_bounds = array<i64: 8, 128>}, {pipeline_mode = #tpu.pipeline_mode<synchronous>, transform_indices = @transform_4, window_bounds = array<i64: 1, 128>}, {transform_indices = @transform_5, window_bounds = array<i64: 1, 16, 128>}]} {
    %0 = arith.index_cast %arg0 : i32 to index
    %1 = memref.load %arg2[%0] : memref<2xi32, #tpu.memory_space<smem>>
    %c16_i32 = arith.constant 16 : i32
    %2 = arith.muli %arg1, %c16_i32 : i32
    %3 = arith.cmpi slt, %2, %1 : i32
    %4 = arith.extui %3 : i1 to i32
    %c0_i32 = arith.constant 0 : i32
    %5 = arith.cmpi ne, %4, %c0_i32 : i32
    scf.if %5 {
      %c0 = arith.constant 0 : index
      %c0_1 = arith.constant 0 : index
      %c0_2 = arith.constant 0 : index
      %9 = vector.load %arg3[%c0, %c0_1, %c0_2] : memref<1x16x8xf32, #tpu.memory_space<vmem>>, vector<1x16x8xf32>
      %10 = vector.shape_cast %9 : vector<1x16x8xf32> to vector<16x8xf32>
      %11 = arith.truncf %10 : vector<16x8xf32> to vector<16x8xbf16>
      %c0_3 = arith.constant 0 : index
      %c0_4 = arith.constant 0 : index
      %c0_5 = arith.constant 0 : index
      %12 = vector.load %arg4[%c0_3, %c0_4, %c0_5] : memref<1x16x8xf32, #tpu.memory_space<vmem>>, vector<1x16x8xf32>
      %13 = vector.shape_cast %12 : vector<1x16x8xf32> to vector<16x8xf32>
      %14 = arith.truncf %13 : vector<16x8xf32> to vector<16x8xbf16>
      %c0_6 = arith.constant 0 : index
      %c0_7 = arith.constant 0 : index
      %15 = vector.load %arg5[%c0_6, %c0_7] : memref<8x128xbf16, #tpu.memory_space<vmem>>, vector<8x128xbf16>
      %cst = arith.constant dense<0.000000e+00> : vector<16x128xf32>
      %16 = tpu.matmul %11, %15, %cst {dimension_numbers = #tpu.dot_dimension_numbers<[1], [0], [0], [1], [0, 0, 1, 1], [], []>} : vector<16x8xbf16>, vector<8x128xbf16>, vector<16x128xf32> -> vector<16x128xf32>
      %c0_8 = arith.constant 0 : index
      %c0_9 = arith.constant 0 : index
      %17 = vector.load %arg6[%c0_8, %c0_9] : memref<8x128xbf16, #tpu.memory_space<vmem>>, vector<8x128xbf16>
      %cst_10 = arith.constant dense<0.000000e+00> : vector<16x128xf32>
      %18 = tpu.matmul %14, %17, %cst_10 {dimension_numbers = #tpu.dot_dimension_numbers<[1], [0], [0], [1], [0, 0, 1, 1], [], []>} : vector<16x8xbf16>, vector<8x128xbf16>, vector<16x128xf32> -> vector<16x128xf32>
      %19 = arith.addf %16, %18 : vector<16x128xf32>
      %c0_11 = arith.constant 0 : index
      %c0_12 = arith.constant 0 : index
      %20 = vector.load %arg7[%c0_11, %c0_12] : memref<1x128xf32, #tpu.memory_space<vmem>>, vector<1x128xf32>
      %21 = vector.broadcast %20 : vector<1x128xf32> to vector<16x128xf32>
      %22 = arith.addf %19, %21 : vector<16x128xf32>
      %cst_13 = arith.constant 0.000000e+00 : f32
      %23 = vector.broadcast %cst_13 : f32 to vector<16x128xf32>
      %24 = arith.maximumf %22, %23 : vector<16x128xf32>
      %25 = tpu.iota {dimensions = array<i32: 0>} : vector<16x1xi32>
      %26 = vector.broadcast %2 : i32 to vector<16x1xi32>
      %27 = arith.addi %26, %25 : vector<16x1xi32>
      %28 = vector.broadcast %1 : i32 to vector<16x1xi32>
      %29 = arith.cmpi slt, %27, %28 : vector<16x1xi32>
      %cst_14 = arith.constant 0.000000e+00 : f32
      %30 = vector.shape_cast %29 : vector<16x1xi1> to vector<16x1xi1>
      %31 = vector.broadcast %30 : vector<16x1xi1> to vector<16x128xi1>
      %32 = vector.broadcast %cst_14 : f32 to vector<16x128xf32>
      %33 = arith.select %31, %24, %32 : vector<16x128xi1>, vector<16x128xf32>
      %c0_15 = arith.constant 0 : index
      %c0_16 = arith.constant 0 : index
      %c0_17 = arith.constant 0 : index
      %34 = vector.load %arg8[%c0_15, %c0_16, %c0_17] : memref<1x16x128xf32, #tpu.memory_space<vmem>>, vector<1x16x128xf32>
      %35 = vector.shape_cast %34 : vector<1x16x128xf32> to vector<16x128xf32>
      %36 = vector.shape_cast %33 : vector<16x128xf32> to vector<1x16x128xf32>
      tpu.vector_store %arg8[%c0_15, %c0_16, %c0_17], %36 {strides = array<i32>} : memref<1x16x128xf32, #tpu.memory_space<vmem>>, vector<1x16x128xf32>,
    } else {
    }
    %6 = arith.cmpi sge, %2, %1 : i32
    %7 = arith.extui %6 : i1 to i32
    %c0_i32_0 = arith.constant 0 : i32
    %8 = arith.cmpi ne, %7, %c0_i32_0 : i32
    scf.if %8 {
      %cst = arith.constant 0.000000e+00 : f32
      %9 = vector.broadcast %cst : f32 to vector<1x16x128xf32>
      %c0 = arith.constant 0 : index
      %c0_1 = arith.constant 0 : index
      %c0_2 = arith.constant 0 : index
      %10 = vector.load %arg8[%c0, %c0_1, %c0_2] : memref<1x16x128xf32, #tpu.memory_space<vmem>>, vector<1x16x128xf32>
      tpu.vector_store %arg8[%c0, %c0_1, %c0_2], %9 {strides = array<i32>} : memref<1x16x128xf32, #tpu.memory_space<vmem>>, vector<1x16x128xf32>,
    } else {
    }
    return
  }
  func.func @transform_0(%arg0: i32, %arg1: i32, %arg2: memref<2xi32, #tpu.memory_space<smem>>) -> (i32, i32, i32) {
    %c0_i32 = arith.constant 0 : i32
    %c0_i32_0 = arith.constant 0 : i32
    return %arg0, %arg1, %c0_i32 : i32, i32, i32
  }
  func.func @transform_1(%arg0: i32, %arg1: i32, %arg2: memref<2xi32, #tpu.memory_space<smem>>) -> (i32, i32, i32) {
    %c0_i32 = arith.constant 0 : i32
    %c0_i32_0 = arith.constant 0 : i32
    return %arg0, %arg1, %c0_i32 : i32, i32, i32
  }
  func.func @transform_2(%arg0: i32, %arg1: i32, %arg2: memref<2xi32, #tpu.memory_space<smem>>) -> (i32, i32) {
    %c0_i32 = arith.constant 0 : i32
    %c0_i32_0 = arith.constant 0 : i32
    %c0_i32_1 = arith.constant 0 : i32
    return %c0_i32, %c0_i32_0 : i32, i32
  }
  func.func @transform_3(%arg0: i32, %arg1: i32, %arg2: memref<2xi32, #tpu.memory_space<smem>>) -> (i32, i32) {
    %c0_i32 = arith.constant 0 : i32
    %c0_i32_0 = arith.constant 0 : i32
    %c0_i32_1 = arith.constant 0 : i32
    return %c0_i32, %c0_i32_0 : i32, i32
  }
  func.func @transform_4(%arg0: i32, %arg1: i32, %arg2: memref<2xi32, #tpu.memory_space<smem>>) -> (i32, i32) {
    %c0_i32 = arith.constant 0 : i32
    %c0_i32_0 = arith.constant 0 : i32
    %c0_i32_1 = arith.constant 0 : i32
    return %c0_i32, %c0_i32_0 : i32, i32
  }
  func.func @transform_5(%arg0: i32, %arg1: i32, %arg2: memref<2xi32, #tpu.memory_space<smem>>) -> (i32, i32, i32) {
    %c0_i32 = arith.constant 0 : i32
    %c0_i32_0 = arith.constant 0 : i32
    return %arg0, %arg1, %c0_i32 : i32, i32, i32
  }
}

</mosaic_0001>

<bundles_post_ra>
// kernel: feature_extractor.1
= control target key start
LH: loop header
LB: loop body
LE: loop exit
PB: predicated region body
PF: predicated region fallthrough
CT: control target
= control target key end

     0   :  { %s589_s24 = smov [#allocation3]   ;;  %s685_s0 = inlined_call_operand.vmem [shape: s32[2], index: 0, kind: input, shape index: {}]   ;;  %s686_s1 = inlined_call_operand.vmem [shape: f32[2,16,8], index: 1, kind: input, shape index: {}]   ;;  %s687_s2 = inlined_call_operand.vmem [shape: f32[2,16,8], index: 2, kind: input, shape index: {}]   ;;  %s688_s3 = inlined_call_operand.vmem [shape: bf16[8,128], index: 3, kind: input, shape index: {}]   ;;  %s689_s4 = inlined_call_operand.vmem [shape: bf16[8,128], index: 4, kind: input, shape index: {}]   ;;  %s690_s5 = inlined_call_operand.vmem [shape: f32[1,128], index: 5, kind: input, shape index: {}]   ;;  %s691_s6 = inlined_call_operand.vmem [shape: f32[2,15,128], index: 6, kind: output, shape index: {}]  }
   0x1   :  { %s12_s23 = sshll.u32 %s685_s0, 4  ;;  %s13_s23 = int_to_ptr.vmem [resolvable:$true] %s12_s23 }
   0x2   :  { %15 = dma.vmem_to_smem %s13_s23, 16, %s589_s24, [#allocation2] }
   0x3   :  { %575 = dma.done.wait [#allocation2], 16 }
   0x4   :  { %576 = vsyncadd [#allocation2], 4294967280 }
   0x5   :  { %18 = sfence }
   0x6   :  { %s629_s25 = smov 0   ;;  %s631_s26 = smov 0  }
   0x7   :  { %s633_s27 = smov 0  }
   0x8 LB: > { %s36_s0 = sadd.s32 1, %s583_s26  ;;  %p506_p0 = scmp.ge.s32.totalorder %s587_s27, 1  ;;  %s587_s27 = sphi %s633_s27, %s24_s27   ;;  %s583_s26 = sphi %s631_s26, %s693_s26   ;;  %s579_s25 = sphi %s629_s25, %s692_s25  }
   0x9   : > { %p38_p1 = scmp.ge.s32.totalorder %s36_s0, 2  ;;  %p234_p2 = scmp.lt.s32.totalorder %s587_s27, 3 }
   0xb   : > { %s695_s0 = smov (%p38_p1, %s36_s0), 0  ;;  %p235_p3 = pnand %p506_p0, %p234_p2 }
   0xc   : > { %p280_p4 = scmp.lt.s32.totalorder (!%p235_p3), %s579_s25, 1  ;;  %s647_s28 = sld [smem:[#allocation3 + %s579_s25]] (!%p235_p3) }
   0xd   : > { %238 = sbr.rel (%p235_p3) target bundleno = 184 (0xb8), region = 40 }
  0x12   : > { %s697_s25 = smov (!%p280_p4, %s579_s25), 1  ;;  %p514_p5 = scmp.le.s32.totalorder %s647_s28, 0 }
  0x13   : > { %s521_s29 = sshll.u32 %s697_s25, 4 }
  0x14   : > { %s287_s8 = scalar_lea.vmem %s686_s1, %s521_s29  ;;  %s297_s11 = scalar_lea.vmem %s687_s2, %s521_s29 }
  0x15   : > { %s658_s14 = scalar_lea.vmem %s691_s6, %s521_s29  ;;  %315 = sbr.rel (%p514_p5) target bundleno = 174 (0xae), region = 44 }
  0x1a   : > { %v323_v0 = vld [vmem:[%s689_s4] sm:$0xf]  ;;  %vm328_vm0 = vcmask 1043456   ;;  %v320_v5 = vld [vmem:[%s297_s11 + $0x8] sm:$0xff]  ;;  %vm324_vm1 = vcmask 64512   ;;  %v374_v10 = vlaneseq  ;;  %v380_v16 = vstv %s647_s28 }
  0x1b   : > { %v322_v1 = vld [vmem:[%s688_s3] sm:$0xf]  ;;  %v330_v3 = vsel %vm328_vm0, %v323_v0, 0  ;;  %v317_v7 = vld [vmem:[%s287_s8 + $0x8] sm:$0xff] }
  0x1c   : > { %v319_v2 = vld [vmem:[%s297_s11] sm:$0xff]  ;;  %v350_v4 = vsel %vm328_vm0, %v322_v1, 0  ;;  %339 = vmatpush.bf16.msra.mxu0 %v330_v3  ;;  %v375_v14 = vshrl.u32 %v374_v10, 7 }
  0x1d   : > { %v316_v6 = vld [vmem:[%s287_s8] sm:$0xff]  ;;  %359 = vmatpush.bf16.msra.mxu1 %v350_v4  ;;  %v321_v8 = vpack.c.bf16 %v320_v5, %v319_v2 }
  0x1e   : > { %v318_v9 = vpack.c.bf16 %v317_v7, %v316_v6  ;;  %v550_v11 = vld [vmem:[%s690_s5] ss:$0 sm:$0xff]  ;;  %vm381_vm2 = vcmp.lt.s32.totalorder %v375_v14, %v380_v16  ;;  %v376_v22 = vadd.s32 8, %v375_v14 }
  0x1f   : > { %515 = vmatmul.msk.bf16.vlgmr.msra.gmra.mxu0 %vm324_vm1, %v321_v8 }
  0x20   : > { %516 = vmatmul.msk.bf16.vlgmr.msra.gmra.mxu1 %vm324_vm1, %v318_v9  ;;  %vm382_vm3 = vcmp.lt.s32.totalorder %v376_v22, %v380_v16 }
  0x9c   : > { %v341_v12 = vpop.f32.mrf.mxu0 }
  0x9d   : > { %v361_v13 = vpop.f32.mrf.mxu1 }
  0x9e   : > { %v362_v15 = vadd.f32 %v361_v13, %v341_v12 }
  0xa0   : > { %v370_v17 = vadd.f32 %v550_v11, %v362_v15 }
  0xa2   : > { %v372_v18 = vmax.f32 %v370_v17, 0.0 }
  0xa4   : > { %v387_v19 = vsel %vm381_vm2, %v372_v18, 0.0  ;;  %v343_v20 = vpop.f32.mrf.mxu0 }
  0xa5   : > { %389 = vst [vmem:[%s658_s14] sm:$0xff] %v387_v19  ;;  %v363_v21 = vpop.f32.mrf.mxu1 }
  0xa6   : > { %v364_v23 = vadd.f32 %v363_v21, %v343_v20 }
  0xa8   : > { %v371_v24 = vadd.f32 %v550_v11, %v364_v23 }
  0xaa   : > { %v373_v25 = vmax.f32 %v371_v24, 0.0 }
  0xac   : > { %v388_v26 = vsel %vm382_vm3, %v373_v25, 0.0 }
  0xad   : > { %390 = vst [vmem:[%s658_s14 + $0x8] sm:$0xff] %v388_v26 }
  0xae PF: > { %p518_p6 = scmp.gt.s32.totalorder %s647_s28, 0 }
  0xb0   : > { %394 = sbr.rel (%p518_p6) target bundleno = 184 (0xb8), region = 48 }
  0xb5   : > { %v590_v27 = vmov 0.0  }
  0xb6   : > { %395 = vst [vmem:[%s658_s14] sm:$0xff] %v590_v27 }
  0xb7   : > { %396 = vst [vmem:[%s658_s14 + $0x8] sm:$0xff] %v590_v27 }
  0xb8 PF: > { %s24_s27 = sadd.s32 1, %s587_s27   ;;  %s692_s25 = smov %s583_s26 }
  0xb9   : > { %p21_p7 = scmp.ge.s32.totalorder %s24_s27, 4   ;;  %s693_s26 = smov %s695_s0 }
  0xbb   :  { %23 = sbr.rel (!%p21_p7) target bundleno = 8 (0x8), region = 81 }

</bundles_post_ra>
